<compile_context>
chip_gen: v7x
topology: tpu7x:2x2x1
jax: 0.10.0
libtpu: 0.0.40
codegen_flags: <defaults>
</compile_context>

<pallas_src>
import jax
import jax.numpy as jnp
from jax.experimental import pallas as pl
from jax.experimental.pallas import tpu as pltpu


def _round_down(x, m):
    return (x // m) * m


def _vmem_capacity_bytes():
    """Physical VMEM size of the local TPU generation (conservative fallback)."""
    try:
        return int(pltpu.get_tpu_info().vmem_capacity_bytes)
    except Exception:
        pass
    try:
        kind = jax.devices()[0].device_kind.lower()
        if any(k in kind for k in ("v4", "v5", "v5e", "v5 lite", "v6", "v6e")):
            return 128 << 20
    except Exception:
        pass
    return 64 << 20  # assume v7x-sized VMEM (safe everywhere)


def _make_conv1x1_kernel(c_in, nb, t, ct, use_mxu):
    """Kernel over blocks x:(nb, C_in, T), w:(co_t, C_in), o:(nb, co_t, T)."""
    n_full = t // ct
    tail = t - n_full * ct
    ct_aligned = (ct % 128 == 0)

    def kernel(x_ref, w_ref, o_ref):
        w = w_ref[...]                                   # (co_t, C_in), resident
        wf = None if use_mxu else w.astype(jnp.float32)

        def compute_chunk(b, lane0, width):
            xc = x_ref[b, :, pl.ds(lane0, width)]        # (C_in, width)
            if use_mxu:
                acc = jnp.dot(w, xc, preferred_element_type=jnp.float32)
            else:
                # Tiny C_in: unrolled VPU broadcast-MAC (f32 accumulation).
                xf = xc.astype(jnp.float32)
                acc = wf[:, 0:1] * xf[0:1, :]
                for ci in range(1, c_in):
                    acc = acc + wf[:, ci:ci + 1] * xf[ci:ci + 1, :]
            o_ref[b, :, pl.ds(lane0, width)] = acc.astype(o_ref.dtype)

        def do_batch(b):
            if n_full == 1 and tail == 0:
                compute_chunk(b, 0, ct)
            else:
                @pl.loop(0, n_full)
                def _chunks(c):
                    lane0 = c * ct
                    if ct_aligned:
                        lane0 = pl.multiple_of(lane0, 128)
                    compute_chunk(b, lane0, ct)

                if tail:
                    compute_chunk(b, n_full * ct, tail)

        if nb == 1:
            do_batch(0)
        else:
            @pl.loop(0, nb)
            def _batch(b):
                do_batch(b)

    return kernel


def conv1x1(x_nchw, weight):
    """Pointwise 1x1 conv, bias=False.

    x_nchw: [N, C_in, H, W]
    weight: [C_out, C_in] or Conv2d-style [C_out, C_in, 1, 1]
    returns [N, C_out, H, W]
    """
    N, C_in, H, W = x_nchw.shape
    if weight.ndim == 4:
        weight = weight.reshape(weight.shape[0], weight.shape[1])
    C_out, C_in_w = weight.shape
    assert C_in_w == C_in, "weight/input channel mismatch"

    # Avoid mixed-precision dot in-kernel: cast the (small) weight once in HBM.
    weight = weight.astype(x_nchw.dtype)

    HW = H * W
    itemsize = jnp.dtype(x_nchw.dtype).itemsize

    # Free reshape: channels stay on sublanes, pixels on lanes.
    x3 = x_nchw.reshape(N, C_in, HW)

    # ---- generation-aware VMEM budgets -------------------------------------
    vmem_cap = _vmem_capacity_bytes()
    if vmem_cap >= (100 << 20):          # v5e / v6e: 128 MiB physical VMEM
        tile_budget = 80 << 20
        vmem_limit_cap = 104 << 20
    else:                                # v7x: 64 MiB physical VMEM
        tile_budget = 36 << 20
        vmem_limit_cap = 52 << 20

    # ---- C_out slab so the weight slab stays small in VMEM ------------------
    w_bytes = C_out * C_in * itemsize
    if w_bytes <= (4 << 20):
        co_t = C_out
    else:
        co_t = (4 << 20) // max(1, C_in * itemsize)
        co_t = max(8, min(512, _round_down(co_t, 8)))
        co_t = min(co_t, C_out)
    w_block_bytes = co_t * C_in * itemsize

    # ---- HW tile / batch sub-block from the budget ---------------------------
    avail = max(1 << 20, tile_budget - w_block_bytes)
    # Double-buffered x + out bytes per pixel lane, per batch element.
    per_lane = 2 * (C_in + co_t) * itemsize

    if HW <= 128 or per_lane * HW <= avail:
        # Whole pixel row fits: take full HW and fatten the DMA with batch.
        t = HW
        nb = int(max(1, min(N, avail // max(1, per_lane * HW))))
    else:
        t = int(min(_round_down(avail // per_lane, 128), _round_down(HW, 128)))
        t = max(128, t)
        nb = 1

    # v7x has two TensorCores: guarantee >=2 steps along a "parallel" axis.
    def _steps():
        return pl.cdiv(N, nb) * pl.cdiv(C_out, co_t) * pl.cdiv(HW, t)

    if _steps() < 2:
        if nb >= 2:
            nb = (nb + 1) // 2
        elif t >= 256:
            t = max(128, _round_down(t // 2, 128))

    # ---- in-kernel lane strip-mine (keep live values ~vreg-file sized) ------
    if t >= 256:
        ct = min(2048, _round_down(t, 128))
    else:
        ct = t
    chunk_bytes_per_lane = C_in * itemsize + co_t * (itemsize + 4)  # x + acc + out
    ct_cap = max(128, _round_down((256 * 1024) // max(1, chunk_bytes_per_lane), 128))
    if ct > ct_cap:
        ct = ct_cap

    use_mxu = C_in > 4
    kernel = _make_conv1x1_kernel(C_in, nb, t, ct, use_mxu)

    grid = (pl.cdiv(N, nb), pl.cdiv(C_out, co_t), pl.cdiv(HW, t))

    # ---- VMEM limit / cost hint ---------------------------------------------
    x_block_bytes = nb * C_in * t * itemsize
    o_block_bytes = nb * co_t * t * itemsize
    work_vmem = 2 * (x_block_bytes + o_block_bytes) + 2 * w_block_bytes
    vmem_limit = int(min(max(work_vmem + (8 << 20), 32 << 20), vmem_limit_cap))

    n_co_blocks = pl.cdiv(C_out, co_t)
    flops = 2 * N * HW * C_in * C_out
    bytes_accessed = (N * C_in * HW * n_co_blocks   # x re-read per C_out slab
                      + C_out * C_in
                      + N * C_out * HW) * itemsize

    # Single-buffer the weight only when it is big enough to matter (its
    # index_map is constant along n/hw, so double buffering buys nothing).
    if w_block_bytes >= (256 << 10):
        w_spec = pl.BlockSpec((co_t, C_in), lambda n, co, j: (co, 0),
                              pipeline_mode=pl.Buffered(1))
    else:
        w_spec = pl.BlockSpec((co_t, C_in), lambda n, co, j: (co, 0))

    out3 = pl.pallas_call(
        kernel,
        out_shape=jax.ShapeDtypeStruct((N, C_out, HW), x_nchw.dtype),
        grid_spec=pltpu.PrefetchScalarGridSpec(
            num_scalar_prefetch=0,
            grid=grid,
            in_specs=[
                # x: nb batch elements, all C_in, a lane tile of pixels
                pl.BlockSpec((nb, C_in, t), lambda n, co, j: (n, 0, j)),
                # weight: one (co_t, C_in) slab
                w_spec,
            ],
            out_specs=pl.BlockSpec((nb, co_t, t), lambda n, co, j: (n, co, j)),
        ),
        compiler_params=pltpu.CompilerParams(
            dimension_semantics=("parallel", "parallel", "parallel"),
            vmem_limit_bytes=vmem_limit,
        ),
        cost_estimate=pl.CostEstimate(
            flops=flops, transcendentals=0, bytes_accessed=bytes_accessed
        ),
    )(x3, weight)

    # Free reshape back to NCHW.
    return out3.reshape(N, C_out, H, W)


if __name__ == "__main__":
    key = jax.random.PRNGKey(0)
    kx, kw = jax.random.split(key)

    N, C_in, C_out, H, Wd = 2, 4, 8, 16, 16
    x = jax.random.normal(kx, (N, C_in, H, Wd), dtype=jnp.float32)
    # Conv2d weight shape [C_out, C_in, 1, 1]
    weight = jax.random.normal(kw, (C_out, C_in, 1, 1), dtype=jnp.float32) * 0.1

    out = conv1x1(x, weight)
    jax.block_until_ready(out)

    # Reference: plain-JAX pointwise conv (einsum over channels)
    ref = jnp.einsum("nchw,oc->nohw", x, weight.reshape(C_out, C_in))
    assert out.shape == (N, C_out, H, Wd)
    assert jnp.allclose(out, ref, atol=1e-5, rtol=1e-5)

    print("KERNEL_OK")
</pallas_src>

<mosaic_0001>
module attributes {stable_mosaic.version = 11 : i64} {
  func.func @kernel(%arg0: i32, %arg1: i32, %arg2: i32, %arg3: memref<1x4x256xf32, #tpu.memory_space<vmem>>, %arg4: memref<8x4xf32, #tpu.memory_space<vmem>>, %arg5: memref<1x8x256xf32, #tpu.memory_space<vmem>>) attributes {dimension_semantics = [#tpu.dimension_semantics<parallel>, #tpu.dimension_semantics<parallel>, #tpu.dimension_semantics<parallel>], iteration_bounds = array<i64: 2, 1, 1>, scalar_prefetch = 0 : i64, scratch_operands = 0 : i64, tpu.core_type = #tpu.core_type<tc>, window_params = [{transform_indices = @transform_0, window_bounds = array<i64: 1, 4, 256>}, {transform_indices = @transform_1, window_bounds = array<i64: 8, 4>}, {transform_indices = @transform_2, window_bounds = array<i64: 1, 8, 256>}]} {
    %c0 = arith.constant 0 : index
    %c0_0 = arith.constant 0 : index
    %0 = vector.load %arg4[%c0, %c0_0] : memref<8x4xf32, #tpu.memory_space<vmem>>, vector<8x4xf32>
    %c0_1 = arith.constant 0 : index
    %c0_2 = arith.constant 0 : index
    %c0_3 = arith.constant 0 : index
    %1 = vector.load %arg3[%c0_1, %c0_2, %c0_3] : memref<1x4x256xf32, #tpu.memory_space<vmem>>, vector<1x4x256xf32>
    %2 = vector.shape_cast %1 : vector<1x4x256xf32> to vector<4x256xf32>
    %3 = vector.extract_strided_slice %0 {offsets = [0, 0], sizes = [8, 1], strides = [1, 1]} : vector<8x4xf32> to vector<8x1xf32>
    %4 = vector.extract_strided_slice %2 {offsets = [0, 0], sizes = [1, 256], strides = [1, 1]} : vector<4x256xf32> to vector<1x256xf32>
    %5 = vector.broadcast %3 : vector<8x1xf32> to vector<8x256xf32>
    %6 = vector.broadcast %4 : vector<1x256xf32> to vector<8x256xf32>
    %7 = arith.mulf %5, %6 : vector<8x256xf32>
    %8 = vector.extract_strided_slice %0 {offsets = [0, 1], sizes = [8, 1], strides = [1, 1]} : vector<8x4xf32> to vector<8x1xf32>
    %9 = vector.extract_strided_slice %2 {offsets = [1, 0], sizes = [1, 256], strides = [1, 1]} : vector<4x256xf32> to vector<1x256xf32>
    %10 = vector.broadcast %8 : vector<8x1xf32> to vector<8x256xf32>
    %11 = vector.broadcast %9 : vector<1x256xf32> to vector<8x256xf32>
    %12 = arith.mulf %10, %11 : vector<8x256xf32>
    %13 = arith.addf %7, %12 : vector<8x256xf32>
    %14 = vector.extract_strided_slice %0 {offsets = [0, 2], sizes = [8, 1], strides = [1, 1]} : vector<8x4xf32> to vector<8x1xf32>
    %15 = vector.extract_strided_slice %2 {offsets = [2, 0], sizes = [1, 256], strides = [1, 1]} : vector<4x256xf32> to vector<1x256xf32>
    %16 = vector.broadcast %14 : vector<8x1xf32> to vector<8x256xf32>
    %17 = vector.broadcast %15 : vector<1x256xf32> to vector<8x256xf32>
    %18 = arith.mulf %16, %17 : vector<8x256xf32>
    %19 = arith.addf %13, %18 : vector<8x256xf32>
    %20 = vector.extract_strided_slice %0 {offsets = [0, 3], sizes = [8, 1], strides = [1, 1]} : vector<8x4xf32> to vector<8x1xf32>
    %21 = vector.extract_strided_slice %2 {offsets = [3, 0], sizes = [1, 256], strides = [1, 1]} : vector<4x256xf32> to vector<1x256xf32>
    %22 = vector.broadcast %20 : vector<8x1xf32> to vector<8x256xf32>
    %23 = vector.broadcast %21 : vector<1x256xf32> to vector<8x256xf32>
    %24 = arith.mulf %22, %23 : vector<8x256xf32>
    %25 = arith.addf %19, %24 : vector<8x256xf32>
    %c0_4 = arith.constant 0 : index
    %c0_5 = arith.constant 0 : index
    %c0_6 = arith.constant 0 : index
    %26 = vector.load %arg5[%c0_4, %c0_5, %c0_6] : memref<1x8x256xf32, #tpu.memory_space<vmem>>, vector<1x8x256xf32>
    %27 = vector.shape_cast %26 : vector<1x8x256xf32> to vector<8x256xf32>
    %28 = vector.shape_cast %25 : vector<8x256xf32> to vector<1x8x256xf32>
    tpu.vector_store %arg5[%c0_4, %c0_5, %c0_6], %28 {strides = array<i32>} : memref<1x8x256xf32, #tpu.memory_space<vmem>>, vector<1x8x256xf32>,
    return
  }
  func.func @transform_0(%arg0: i32, %arg1: i32, %arg2: i32) -> (i32, i32, i32) {
    %c0_i32 = arith.constant 0 : i32
    %c0_i32_0 = arith.constant 0 : i32
    return %arg0, %c0_i32, %arg2 : i32, i32, i32
  }
  func.func @transform_1(%arg0: i32, %arg1: i32, %arg2: i32) -> (i32, i32) {
    %c0_i32 = arith.constant 0 : i32
    %c0_i32_0 = arith.constant 0 : i32
    return %arg1, %c0_i32 : i32, i32
  }
  func.func @transform_2(%arg0: i32, %arg1: i32, %arg2: i32) -> (i32, i32, i32) {
    %c0_i32 = arith.constant 0 : i32
    return %arg0, %arg1, %arg2 : i32, i32, i32
  }
}

</mosaic_0001>

<bundles_post_ra>
// kernel: tpu_custom_call.1
= control target key start
LH: loop header
LB: loop body
LE: loop exit
PB: predicated region body
PF: predicated region fallthrough
CT: control target
= control target key end

     0   :  { %7 = vsyncpa [#allocation3], 0  ;;  %s837_s0 = inlined_call_operand.hbm [shape: f32[2,4,256], index: 0, kind: input, shape index: {}]   ;;  %s838_s1 = inlined_call_operand.vmem [shape: f32[8,4], index: 1, kind: input, shape index: {}]   ;;  %s839_s2 = inlined_call_operand.hbm [shape: f32[2,8,256], index: 2, kind: output, shape index: {}]  }
   0x1   :  { %9 = vsyncpa [#allocation3 + $0x1], 0 }
   0x2   :  { %10 = vsyncpa [#allocation4], 0 }
   0x3   :  { %12 = vsyncpa [#allocation4 + $0x1], 0  ;;  %s661_s9 = smov 0   ;;  %s663_s10 = smov 0  }
   0x4   :  { %s665_s11 = smov 0   ;;  %s667_s12 = smov 0  }
   0x5   :  { %s669_s13 = smov 0   ;;  %s671_s14 = smov 0  }
   0x6 LB: > { %s437_s15 = sadd.s32 4294967295, %s638_s14   ;;  %s438_s16 = sadd.s32 4294967294, %s638_s14   ;;  %s638_s14 = sphi %s671_s14, %s18_s14   ;;  %s634_s13 = sphi %s669_s13, %s855_s13   ;;  %s630_s12 = sphi %s667_s12, %s854_s12   ;;  %s626_s11 = sphi %s665_s11, %s853_s11   ;;  %s622_s10 = sphi %s663_s10, %s852_s10   ;;  %s618_s9 = sphi %s661_s9, %s851_s9  }
   0x7   : > { %s37_s17 = sadd.s32 1, %s634_s13  ;;  %s46_s18 = sadd.s32 1, %s626_s11 }
   0x8   : > { %p39_p0 = scmp.ge.s32.totalorder %s37_s17, 2  ;;  %p53_p1 = scmp.ne.s32.totalorder %s626_s11, %s622_s10 }
   0x9   : > { %p54_p2 = scmp.eq.s32.totalorder %s638_s14, 0  ;;  %p59_p3 = scmp.ne.s32.totalorder %s622_s10, %s618_s9 }
   0xa   : > { %s857_s17 = smov (%p39_p0, %s37_s17), 0  ;;  %p60_p5 = scmp.eq.s32.totalorder %s437_s15, 0 }
   0xb   : > { %p702_p4 = por %p54_p2, %p53_p1  ;;  %s41_s20 = ssub.s32 %s634_s13, %s857_s17 }
   0xc   : > { %p113_p6 = scmp.eq.s32.totalorder %s437_s15, 1  ;;  %p44_p7 = scmp.eq.s32.totalorder %s41_s20, 0 }
   0xd   : > { %p708_p8 = por %p60_p5, %p59_p3  ;;  %p119_p10 = scmp.eq.s32.totalorder %s438_s16, 1 }
   0xe   : > { %p712_p9 = por %p113_p6, %p53_p1  ;;  %p467_p13 = scmp.lt.s32.totalorder %s638_s14, 2 }
   0xf   : > { %s717_s23 = scalar_select %p44_p7, %s626_s11, %s46_s18  }
  0x10   : > { %s843_s22 = scalar_select %p712_p9, 1, 0 }
  0x11   : > { %p719_p11 = por %p119_p10, %p59_p3  ;;  %s146_s25 = sand.u32 1, %s626_s11  }
  0x12   : > { %s442_s26 = sshll.u32 %s146_s25, 3  ;;  %s453_s27 = sshll.u32 %s634_s13, 7 }
  0x13   : > { %s844_s24 = scalar_select %p719_p11, 1, 0 }
  0x14   : > { %s730_s30 = scalar_lea.hbm %s837_s0, %s453_s27  ;;  %s150_s3 = scalar_lea.vmem [#allocation2], %s442_s26 }
  0x15   : > { %s160_s4 = sshll.u32 %s150_s3, 4  ;;  %p736_p0 = pnand %p467_p13, %p702_p4  ;;  %s732_s4 = int_to_ptr.vmem [resolvable:$true] %s160_s4 }
  0x16   : > { %s147_s6 = scalar_lea.sflag [#allocation3], %s146_s25  ;;  %s526_s7 = scalar_lea.hbm %s730_s30, 128 }
  0x17   : > { %p527_p3 = scmp.ne.s32.totalorder %s730_s30, %s526_s7  ;;  %p528_p5 = pneg %p736_p0 }
  0x18   : > { %s531_s16 = scalar_lea.hbm %s837_s0, 256  ;;  %p532_p4 = scmp.lt.u32.totalorder %s730_s30, %s837_s0 }
  0x19   : > { %p529_p6 = pnand %p528_p5, %p527_p3  ;;  %p533_p10 = scmp.lt.u32.totalorder %s531_s16, %s526_s7 }
  0x1a   : > { %p535_p12 = scmp.lt.u32.totalorder %s526_s7, %s730_s30 }
  0x1b   : > { %p530_p7 = pneg %p529_p6  ;;  %p534_p13 = por %p533_p10, %p532_p4 }
  0x1d   : > { %p536_p1 = por %p535_p12, %p534_p13 }
  0x1f   : > { %p537_p2 = pnand %p536_p1, %p530_p7 }
  0x21   : > { %540 = shalt.err (!%p537_p2)
}
  0x22   : > { %s541_s20 = scalar_lea.vmem %s732_s4, 128  ;;  %s640_s25 = smov [#allocation2]  }
  0x23   : > { %p542_p3 = scmp.ne.s32.totalorder %s732_s4, %s541_s20  ;;  %s546_s26 = sshll.u32 %s640_s25, 4  ;;  %s547_s26 = int_to_ptr.vmem [resolvable:$false] %s546_s26 }
  0x24   : > { %s548_s27 = scalar_lea.vmem %s547_s26, 256  ;;  %p549_p9 = scmp.lt.s32.totalorder %s732_s4, %s547_s26 }
  0x25   : > { %p544_p6 = pnand %p542_p3, %p528_p5  ;;  %p550_p4 = scmp.lt.s32.totalorder %s548_s27, %s541_s20 }
  0x27   : > { %p545_p11 = pneg %p544_p6  ;;  %p551_p10 = por %p550_p4, %p549_p9 }
  0x29   : > { %p552_p12 = pnand %p551_p10, %p545_p11 }
  0x2b   : > { %555 = shalt.err (!%p552_p12)
}
  0x2c   : > { %462 = dma.hbm_to_vmem [thread:$0]  (!%p736_p0), %s730_s30, 128, %s732_s4, %s147_s6  }
  0x2d   : > { %p846_p1 = scmp.lt.s32.totalorder %s638_s14, 3  ;;  %p847_p2 = scmp.ge.s32.totalorder %s638_s14, 1 }
  0x2f   : > { %p166_p5 = pnand %p847_p2, %p846_p1 }
  0x30   : > { %s772_s28 = sand.u32 (!%p166_p5), 1, %s622_s10  }
  0x31   : > { %169 = sbr.rel (%p166_p5) target bundleno = 214 (0xd6), region = 28  ;;  %s446_s29 = sshll.u32 (!%p166_p5), %s772_s28, 3 }
  0x32   : > { %s172_s3 = scalar_lea.sflag (!%p166_p5), [#allocation3], %s772_s28  ;;  %s175_s7 = scalar_lea.vmem (!%p166_p5), [#allocation2], %s446_s29 }
  0x38   : > { %609 = dma.done.wait (%p708_p8), %s172_s3, 128  }
  0x39   : > { %611 = vsyncadd (%p708_p8), %s172_s3, 4294967168  ;;  %v641_v0 = vmov 0   ;;  %v642_v1 = vmov 2   ;;  %v206_v2 = vld [vmem:[%s838_s1] sm:$0xff]  ;;  %v643_v3 = vmov 1   ;;  %v644_v4 = vmov 3  }
  0x3a   : > { %521 = vset.pattern.permute.xlu0 %v641_v0  ;;  %523 = vset.pattern.permute.xlu1 %v642_v1  ;;  %v214_v5 = vlaneseq  ;;  %v207_v11 = vld [vmem:[%s175_s7] sm:$0xff]  ;;  %s447_s21 = sshll.u32 %s772_s28, 4  ;;  %s454_s5 = sshll.u32 %s630_s12, 8 }
  0x3b   : > { %210 = vperm.xlu0 %521, %v206_v2   ;;  %261 = vperm.xlu1 %523, %v206_v2   ;;  %s199_s6 = scalar_lea.vmem [#allocation5], %s447_s21  ;;  %s788_s18 = scalar_lea.hbm %s839_s2, %s454_s5 }
  0x3c   : > { %v215_v6 = vshrl.u32 %v214_v5, 7  ;;  %s333_s8 = sshll.u32 %s199_s6, 4  ;;  %s315_s19 = scalar_lea.sflag [#allocation4], %s772_s28  ;;  %s790_s8 = int_to_ptr.vmem [resolvable:$true] %s333_s8 }
  0x3d   : > { %s556_s12 = scalar_lea.vmem %s790_s8, 256  ;;  %p848_p9 = scmp.ne.s32.totalorder %s843_s22, 0 }
  0x3e   : > { %v216_v7 = vsub.s32 0, %v215_v6  ;;  %v220_v8 = vsub.s32 4, %v215_v6  ;;  %v240_v9 = vsub.s32 1, %v215_v6  ;;  %v244_v10 = vsub.s32 5, %v215_v6  ;;  %p557_p8 = scmp.ne.s32.totalorder %s790_s8, %s556_s12  ;;  %s645_s20 = smov [#allocation5]  }
  0x3f   : > { %522 = vset.pattern.permute.xlu0 %v643_v3  ;;  %524 = vset.pattern.permute.xlu1 %v644_v4  ;;  %v266_v12 = vsub.s32 2, %v215_v6  ;;  %v270_v13 = vsub.s32 6, %v215_v6  ;;  %v292_v14 = vsub.s32 3, %v215_v6  ;;  %v296_v15 = vsub.s32 7, %v215_v6  ;;  %s560_s25 = sshll.u32 %s645_s20, 4  ;;  %s561_s25 = int_to_ptr.vmem [resolvable:$false] %s560_s25 }
  0x40   : > { %235 = vperm.xlu0 %522, %v206_v2   ;;  %287 = vperm.xlu1 %524, %v206_v2   ;;  %v217_v16 = vrot.slane %v207_v11, %v216_v7  ;;  %v221_v17 = vrot.slane %v207_v11, %v220_v8  ;;  %v241_v18 = vrot.slane %v207_v11, %v240_v9  ;;  %p558_p11 = pnand %p557_p8, %p848_p9  ;;  %s562_s26 = scalar_lea.vmem %s561_s25, 512 }
  0x41   : > { %v245_v19 = vrot.slane %v207_v11, %v244_v10  ;;  %v267_v20 = vrot.slane %v207_v11, %v266_v12  ;;  %v271_v21 = vrot.slane %v207_v11, %v270_v13  ;;  %v293_v24 = vrot.slane %v207_v11, %v292_v14  ;;  %p563_p7 = scmp.lt.s32.totalorder %s790_s8, %s561_s25  ;;  %p564_p13 = scmp.lt.s32.totalorder %s562_s26, %s556_s12 }
  0x42   : > { %v297_v25 = vrot.slane %v207_v11, %v296_v15  ;;  %v227_v26 = vrot.slane %v217_v16, %v216_v7  ;;  %v231_v27 = vrot.slane %v221_v17, %v216_v7  ;;  %v251_v28 = vrot.slane %v241_v18, %v240_v9  ;;  %p559_p0 = pneg %p558_p11 }
  0x43   : > { %v255_v29 = vrot.slane %v245_v19, %v240_v9  ;;  %v277_v30 = vrot.slane %v267_v20, %v266_v12  ;;  %v281_v31 = vrot.slane %v271_v21, %v266_v12  ;;  %v303_v32 = vrot.slane %v293_v24, %v292_v14  ;;  %p565_p3 = por %p564_p13, %p563_p7 }
  0x44   : > { %525 = vset.pattern.permute.xlu0 %v644_v4  ;;  %v307_v33 = vrot.slane %v297_v25, %v292_v14 }
  0x45   : > { %p566_p6 = pnand %p565_p3, %p559_p0 }
  0xba   : > { %v211_v22 = vpop.permute.xlu0 %210  ;;  %v262_v23 = vpop.permute.xlu1 %261 }
  0xbb   : > { %v232_v36 = vmul.f32 %v227_v26, %v211_v22  ;;  %v233_v37 = vmul.f32 %v231_v27, %v211_v22  ;;  %v282_v40 = vmul.f32 %v277_v30, %v262_v23  ;;  %v283_v41 = vmul.f32 %v281_v31, %v262_v23 }
  0xbf   : > { %v236_v34 = vpop.permute.xlu0 %235  ;;  %v288_v35 = vpop.permute.xlu1 %287 }
  0xc0   : > { %v256_v38 = vmul.f32 %v251_v28, %v236_v34  ;;  %v257_v39 = vmul.f32 %v255_v29, %v236_v34  ;;  %v308_v44 = vmul.f32 %v303_v32, %v288_v35  ;;  %v309_v45 = vmul.f32 %v307_v33, %v288_v35 }
  0xc2   : > { %v258_v42 = vadd.f32 %v256_v38, %v232_v36  ;;  %v259_v43 = vadd.f32 %v257_v39, %v233_v37 }
  0xc4   : > { %v284_v46 = vadd.f32 %v282_v40, %v258_v42  ;;  %v285_v47 = vadd.f32 %v283_v41, %v259_v43 }
  0xc6   : > { %v310_v48 = vadd.f32 %v308_v44, %v284_v46  ;;  %v311_v49 = vadd.f32 %v309_v45, %v285_v47 }
  0xc8   : > { %312 = vst [vmem:[%s199_s6] sm:$0xff] %v310_v48  ;;  %313 = vst [vmem:[%s199_s6 + $0x8] sm:$0xff] %v311_v49 }
  0xc9   : > { %569 = shalt.err (!%p566_p6)
}
  0xca   : > { %s570_s27 = scalar_lea.hbm %s788_s18, 256  ;;  %s574_s3 = scalar_lea.hbm %s839_s2, 512 }
  0xcb   : > { %p571_p4 = scmp.ne.s32.totalorder %s788_s18, %s570_s27  ;;  %p575_p1 = scmp.lt.u32.totalorder %s788_s18, %s839_s2 }
  0xcc   : > { %p576_p2 = scmp.lt.u32.totalorder %s574_s3, %s570_s27  ;;  %p578_p8 = scmp.lt.u32.totalorder %s570_s27, %s788_s18 }
  0xcd   : > { %p572_p10 = pnand %p571_p4, %p848_p9 }
  0xce   : > { %p577_p5 = por %p576_p2, %p575_p1 }
  0xcf   : > { %p573_p12 = pneg %p572_p10 }
  0xd0   : > { %p579_p11 = por %p578_p8, %p577_p5 }
  0xd2   : > { %p580_p0 = pnand %p579_p11, %p573_p12 }
  0xd4   : > { %583 = shalt.err (!%p580_p0)
}
  0xd5   : > { %457 = dma.vmem_to_hbm [thread:$0]  (%p848_p9), %s790_s8, 256, %s788_s18, %s315_s19  }
  0xd6 PF: > { %s345_s4 = sand.u32 1, %s618_s9   ;;  %p849_p7 = scmp.ne.s32.totalorder %s844_s24, 0 }
  0xd7   : > { %p850_p13 = scmp.ge.s32.totalorder %s638_s14, 2  ;;  %s346_s21 = scalar_lea.sflag [#allocation4], %s345_s4 }
  0xd9   : > { %p464_p3 = pnand %p850_p13, %p849_p7 }
  0xdb   : > { %613 = dma.done.wait (!%p464_p3), %s346_s21, 256  }
  0xdc   : > { %615 = vsyncadd (!%p464_p3), %s346_s21, 4294967040  ;;  %s18_s14 = sadd.s32 1, %s638_s14   ;;  %s851_s9 = smov %s622_s10 }
  0xdd   : > { %p15_p6 = scmp.ge.s32.totalorder %s18_s14, 4   ;;  %s852_s10 = smov %s626_s11 }
  0xde   : > { %s853_s11 = smov %s717_s23  ;;  %s854_s12 = smov %s634_s13 }
  0xdf   : > { %s855_s13 = smov %s857_s17  ;;  %17 = sbr.rel (!%p15_p6) target bundleno = 6 (0x6), region = 76 }
  0xe6   :  { %351 = vsyncpa [#allocation3], 1 }
  0xe7   :  { %353 = vsyncpa [#allocation3 + $0x1], 1 }
  0xe8   :  { %354 = vsyncpa [#allocation4], 1 }
  0xe9   :  { %356 = vsyncpa [#allocation4 + $0x1], 1 }

</bundles_post_ra>
